<compile_context>
chip_gen: v6e
topology: v6e:2x2x1
jax: 0.10.0
libtpu: 0.0.40
codegen_flags: <defaults>
</compile_context>

<pallas_src>
import functools

import jax
import jax.numpy as jnp
from jax.experimental import pallas as pl
from jax.experimental.pallas import tpu as pltpu


def _round_up(x, m):
    return ((x + m - 1) // m) * m


def _keypoint_loss_kernel(coords_ref, mask_ref, inv_area_ref, inv_sig_ref, out_ref,
                          *, true_n, tile_n, mask_tail):
    # coords_ref:  [4, K, TN]  planes (pred_x, pred_y, gt_x, gt_y), N on lanes
    # mask_ref:    [K, TN]
    # inv_area_ref:[1, TN]     == 1 / (area + 1e-9)
    # inv_sig_ref: [K, 1]      == 1 / (8 * sigma^2)  (folds (2s)^2 and the /2)
    # out_ref:     [1, 1, TN]  lane-dense per-block partial (K already reduced)
    px = coords_ref[0].astype(jnp.float32)
    py = coords_ref[1].astype(jnp.float32)
    gx = coords_ref[2].astype(jnp.float32)
    gy = coords_ref[3].astype(jnp.float32)

    dx = px - gx
    dy = py - gy
    d = dx * dx + dy * dy                                         # [K, TN]

    mask = mask_ref[...].astype(jnp.float32)                      # [K, TN]
    nkpt = mask.shape[0]

    # kpt_loss_factor = K / (sum(mask != 0, over K) + 1e-9)  -> [1, TN]
    nonzero = jnp.sum((mask != 0.0).astype(jnp.float32), axis=0, keepdims=True)
    kpt_loss_factor = jnp.float32(nkpt) / (nonzero + 1e-9)

    # e = d / (2*sigma)^2 / (area + 1e-9) / 2  ==  d * inv_sig * inv_area
    e = d * inv_sig_ref[...] * inv_area_ref[...]                  # [K, TN]
    # Multiply by mask before the factor so all-zero-mask rows stay exactly 0.
    term = kpt_loss_factor * ((1.0 - jnp.exp(-e)) * mask)         # [K, TN]

    if mask_tail:
        # Last block overruns the un-padded arrays: its tail lanes hold
        # undefined data.  Select (not multiply) so NaN/Inf garbage cannot leak.
        col = (pl.program_id(0) * tile_n
               + jax.lax.broadcasted_iota(jnp.int32, term.shape, 1))
        term = jnp.where(col < true_n, term, 0.0)

    # Sublane-only reduce over K; store stays lane-dense and tiny (TN * 4 B).
    out_ref[...] = jnp.sum(term, axis=0, keepdims=True)[None]


def keypoint_loss(pred_kpts, gt_kpts, kpt_mask, area, sigmas, *, max_tile_n=8192):
    """pred_kpts/gt_kpts: [N, K, >=2], kpt_mask: [N, K], area: [N, 1] or [N],
    sigmas: [K].  Returns a scalar f32 loss matching the PyTorch module."""
    n, k = kpt_mask.shape
    if n == 0 or k == 0:
        return jnp.float32(0.0)

    tile_n = min(max_tile_n, _round_up(n, 128))
    num_blocks = (n + tile_n - 1) // tile_n
    mask_tail = (n % tile_n) != 0

    # One stack + one transpose (single copy pass); keep incoming dtype.
    # TODO(synk): upstream keypoint decode could emit [4, K, N]-major planes
    # directly and make this copy disappear.
    coords = jnp.stack(
        [pred_kpts[..., 0], pred_kpts[..., 1], gt_kpts[..., 0], gt_kpts[..., 1]],
        axis=0)                                                   # [4, N, K]
    coords = jnp.transpose(coords, (0, 2, 1))                     # [4, K, N]

    mask_t = jnp.swapaxes(kpt_mask, 0, 1)                         # [K, N]
    inv_area = 1.0 / (area.astype(jnp.float32).reshape(1, n) + 1e-9)   # [1, N]
    inv_sig = (1.0 / (8.0 * jnp.square(sigmas.astype(jnp.float32)))).reshape(k, 1)

    kernel = functools.partial(
        _keypoint_loss_kernel, true_n=n, tile_n=tile_n, mask_tail=mask_tail)

    out = pl.pallas_call(
        kernel,
        out_shape=jax.ShapeDtypeStruct((num_blocks, 1, tile_n), jnp.float32),
        grid_spec=pltpu.PrefetchScalarGridSpec(
            num_scalar_prefetch=0,
            grid=(num_blocks,),
            in_specs=[
                pl.BlockSpec((4, k, tile_n), lambda i: (0, 0, i)),  # packed coords
                pl.BlockSpec((k, tile_n), lambda i: (0, i)),        # mask
                pl.BlockSpec((1, tile_n), lambda i: (0, i)),        # 1/(area+eps)
                pl.BlockSpec((k, 1), lambda i: (0, 0)),             # 1/(8*sigma^2)
            ],
            out_specs=pl.BlockSpec((1, 1, tile_n), lambda i: (i, 0, 0)),
        ),
        compiler_params=pltpu.CompilerParams(
            dimension_semantics=("parallel",),
            vmem_limit_bytes=32 * 1024 * 1024),
    )(coords, mask_t, inv_area, inv_sig)

    # Per-block lane-dense partials -> mean over the TRUE N*K elements.
    return jnp.sum(out) / jnp.float32(n * k)


def keypoint_loss_ref(pred_kpts, gt_kpts, kpt_mask, area, sigmas):
    """Pure-JAX reference matching the PyTorch forward exactly."""
    d = (pred_kpts[..., 0] - gt_kpts[..., 0]) ** 2 + \
        (pred_kpts[..., 1] - gt_kpts[..., 1]) ** 2
    kpt_loss_factor = kpt_mask.shape[1] / (
        jnp.sum((kpt_mask != 0).astype(jnp.float32), axis=1) + 1e-9)
    e = d / (2 * sigmas) ** 2 / (area + 1e-9) / 2
    return jnp.mean(kpt_loss_factor.reshape(-1, 1) * ((1 - jnp.exp(-e)) * kpt_mask))


if __name__ == "__main__":
    key = jax.random.PRNGKey(0)
    N, K = 8, 17  # N matched anchors, K COCO keypoints

    k1, k2, k3, k4 = jax.random.split(key, 4)
    pred_kpts = jax.random.normal(k1, (N, K, 2), dtype=jnp.float32) * 4.0
    gt_kpts = jax.random.normal(k2, (N, K, 2), dtype=jnp.float32) * 4.0
    kpt_mask = (jax.random.uniform(k3, (N, K)) > 0.3).astype(jnp.float32)
    area = jax.random.uniform(k4, (N, 1), minval=10.0, maxval=100.0).astype(jnp.float32)

    # Deterministic "parameter" init: sigmas = ones(K) / K.
    sigmas = jnp.ones((K,), dtype=jnp.float32) / K

    loss = keypoint_loss(pred_kpts, gt_kpts, kpt_mask, area, sigmas)
    loss = jax.block_until_ready(loss)

    ref = keypoint_loss_ref(pred_kpts, gt_kpts, kpt_mask, area, sigmas)
    assert jnp.allclose(loss, ref, rtol=1e-5, atol=1e-6), (loss, ref)

    print("KERNEL_OK")
</pallas_src>

<mosaic_0001>
module attributes {stable_mosaic.version = 11 : i64} {
  func.func @_keypoint_loss_kernel(%arg0: i32, %arg1: memref<4x17x128xf32, #tpu.memory_space<vmem>>, %arg2: memref<17x128xf32, #tpu.memory_space<vmem>>, %arg3: memref<1x128xf32, #tpu.memory_space<vmem>>, %arg4: memref<17x1xf32, #tpu.memory_space<vmem>>, %arg5: memref<1x1x128xf32, #tpu.memory_space<vmem>>) attributes {dimension_semantics = [#tpu.dimension_semantics<parallel>], iteration_bounds = array<i64: 1>, scalar_prefetch = 0 : i64, scratch_operands = 0 : i64, tpu.core_type = #tpu.core_type<tc>, window_params = [{transform_indices = @transform_0, window_bounds = array<i64: 4, 17, 128>}, {transform_indices = @transform_1, window_bounds = array<i64: 17, 128>}, {transform_indices = @transform_2, window_bounds = array<i64: 1, 128>}, {pipeline_mode = #tpu.pipeline_mode<synchronous>, transform_indices = @transform_3, window_bounds = array<i64: 17, 1>}, {transform_indices = @transform_4, window_bounds = array<i64: 1, 1, 128>}]} {
    %c0 = arith.constant 0 : index
    %c0_0 = arith.constant 0 : index
    %c0_1 = arith.constant 0 : index
    %0 = vector.load %arg1[%c0, %c0_0, %c0_1] : memref<4x17x128xf32, #tpu.memory_space<vmem>>, vector<1x17x128xf32>
    %1 = vector.shape_cast %0 : vector<1x17x128xf32> to vector<17x128xf32>
    %c1 = arith.constant 1 : index
    %c0_2 = arith.constant 0 : index
    %c0_3 = arith.constant 0 : index
    %2 = vector.load %arg1[%c1, %c0_2, %c0_3] : memref<4x17x128xf32, #tpu.memory_space<vmem>>, vector<1x17x128xf32>
    %3 = vector.shape_cast %2 : vector<1x17x128xf32> to vector<17x128xf32>
    %c2 = arith.constant 2 : index
    %c0_4 = arith.constant 0 : index
    %c0_5 = arith.constant 0 : index
    %4 = vector.load %arg1[%c2, %c0_4, %c0_5] : memref<4x17x128xf32, #tpu.memory_space<vmem>>, vector<1x17x128xf32>
    %5 = vector.shape_cast %4 : vector<1x17x128xf32> to vector<17x128xf32>
    %c3 = arith.constant 3 : index
    %c0_6 = arith.constant 0 : index
    %c0_7 = arith.constant 0 : index
    %6 = vector.load %arg1[%c3, %c0_6, %c0_7] : memref<4x17x128xf32, #tpu.memory_space<vmem>>, vector<1x17x128xf32>
    %7 = vector.shape_cast %6 : vector<1x17x128xf32> to vector<17x128xf32>
    %8 = arith.subf %1, %5 : vector<17x128xf32>
    %9 = arith.subf %3, %7 : vector<17x128xf32>
    %10 = arith.mulf %8, %8 : vector<17x128xf32>
    %11 = arith.mulf %9, %9 : vector<17x128xf32>
    %12 = arith.addf %10, %11 : vector<17x128xf32>
    %c0_8 = arith.constant 0 : index
    %c0_9 = arith.constant 0 : index
    %13 = vector.load %arg2[%c0_8, %c0_9] : memref<17x128xf32, #tpu.memory_space<vmem>>, vector<17x128xf32>
    %cst = arith.constant 0.000000e+00 : f32
    %14 = vector.broadcast %cst : f32 to vector<17x128xf32>
    %15 = arith.cmpf one, %13, %14 : vector<17x128xf32>
    %16 = arith.extui %15 : vector<17x128xi1> to vector<17x128xi32>
    %17 = arith.sitofp %16 : vector<17x128xi32> to vector<17x128xf32>
    %cst_10 = arith.constant dense<0.000000e+00> : vector<128xf32>
    %18 = vector.multi_reduction <add>, %17, %cst_10 [0] : vector<17x128xf32> to vector<128xf32>
    %19 = vector.shape_cast %18 : vector<128xf32> to vector<1x128xf32>
    %cst_11 = arith.constant 9.99999971E-10 : f32
    %20 = vector.broadcast %cst_11 : f32 to vector<1x128xf32>
    %21 = arith.addf %19, %20 : vector<1x128xf32>
    %cst_12 = arith.constant 1.700000e+01 : f32
    %22 = vector.broadcast %cst_12 : f32 to vector<1x128xf32>
    %23 = arith.divf %22, %21 : vector<1x128xf32>
    %c0_13 = arith.constant 0 : index
    %c0_14 = arith.constant 0 : index
    %24 = vector.load %arg4[%c0_13, %c0_14] : memref<17x1xf32, #tpu.memory_space<vmem>>, vector<17x1xf32>
    %25 = vector.broadcast %24 : vector<17x1xf32> to vector<17x128xf32>
    %26 = arith.mulf %12, %25 : vector<17x128xf32>
    %c0_15 = arith.constant 0 : index
    %c0_16 = arith.constant 0 : index
    %27 = vector.load %arg3[%c0_15, %c0_16] : memref<1x128xf32, #tpu.memory_space<vmem>>, vector<1x128xf32>
    %28 = vector.broadcast %27 : vector<1x128xf32> to vector<17x128xf32>
    %29 = arith.mulf %26, %28 : vector<17x128xf32>
    %cst_17 = arith.constant 0.000000e+00 : f32
    %30 = vector.broadcast %cst_17 : f32 to vector<17x128xf32>
    %31 = arith.subf %30, %29 : vector<17x128xf32>
    %32 = math.exp %31 : vector<17x128xf32>
    %cst_18 = arith.constant 1.000000e+00 : f32
    %33 = vector.broadcast %cst_18 : f32 to vector<17x128xf32>
    %34 = arith.subf %33, %32 : vector<17x128xf32>
    %35 = arith.mulf %34, %13 : vector<17x128xf32>
    %36 = vector.broadcast %23 : vector<1x128xf32> to vector<17x128xf32>
    %37 = arith.mulf %36, %35 : vector<17x128xf32>
    %c128_i32 = arith.constant 128 : i32
    %38 = arith.muli %arg0, %c128_i32 : i32
    %39 = tpu.iota {dimensions = array<i32: 1>} : vector<17x128xi32>
    %40 = vector.broadcast %38 : i32 to vector<17x128xi32>
    %41 = arith.addi %40, %39 : vector<17x128xi32>
    %c8_i32 = arith.constant 8 : i32
    %42 = vector.broadcast %c8_i32 : i32 to vector<17x128xi32>
    %43 = arith.cmpi slt, %41, %42 : vector<17x128xi32>
    %cst_19 = arith.constant 0.000000e+00 : f32
    %44 = vector.broadcast %cst_19 : f32 to vector<17x128xf32>
    %45 = arith.select %43, %37, %44 : vector<17x128xi1>, vector<17x128xf32>
    %cst_20 = arith.constant dense<0.000000e+00> : vector<128xf32>
    %46 = vector.multi_reduction <add>, %45, %cst_20 [0] : vector<17x128xf32> to vector<128xf32>
    %47 = vector.shape_cast %46 : vector<128xf32> to vector<1x128xf32>
    %48 = vector.shape_cast %47 : vector<1x128xf32> to vector<1x1x128xf32>
    %c0_21 = arith.constant 0 : index
    %c0_22 = arith.constant 0 : index
    %c0_23 = arith.constant 0 : index
    %49 = vector.load %arg5[%c0_21, %c0_22, %c0_23] : memref<1x1x128xf32, #tpu.memory_space<vmem>>, vector<1x1x128xf32>
    tpu.vector_store %arg5[%c0_21, %c0_22, %c0_23], %48 {strides = array<i32>} : memref<1x1x128xf32, #tpu.memory_space<vmem>>, vector<1x1x128xf32>,
    return
  }
  func.func @transform_0(%arg0: i32) -> (i32, i32, i32) {
    %c0_i32 = arith.constant 0 : i32
    %c0_i32_0 = arith.constant 0 : i32
    %c0_i32_1 = arith.constant 0 : i32
    return %c0_i32, %c0_i32_0, %arg0 : i32, i32, i32
  }
  func.func @transform_1(%arg0: i32) -> (i32, i32) {
    %c0_i32 = arith.constant 0 : i32
    %c0_i32_0 = arith.constant 0 : i32
    return %c0_i32, %arg0 : i32, i32
  }
  func.func @transform_2(%arg0: i32) -> (i32, i32) {
    %c0_i32 = arith.constant 0 : i32
    %c0_i32_0 = arith.constant 0 : i32
    return %c0_i32, %arg0 : i32, i32
  }
  func.func @transform_3(%arg0: i32) -> (i32, i32) {
    %c0_i32 = arith.constant 0 : i32
    %c0_i32_0 = arith.constant 0 : i32
    %c0_i32_1 = arith.constant 0 : i32
    return %c0_i32, %c0_i32_0 : i32, i32
  }
  func.func @transform_4(%arg0: i32) -> (i32, i32, i32) {
    %c0_i32 = arith.constant 0 : i32
    %c0_i32_0 = arith.constant 0 : i32
    %c0_i32_1 = arith.constant 0 : i32
    return %arg0, %c0_i32, %c0_i32_0 : i32, i32, i32
  }
}

</mosaic_0001>

<bundles_post_ra>
// kernel: tpu_custom_call.1
= control target key start
LH: loop header
LB: loop body
LE: loop exit
PB: predicated region body
PF: predicated region fallthrough
CT: control target
= control target key end

     0   :  { %v203_v2 = vmov 0   ;;  %s305_s0 = inlined_call_operand.vmem [shape: f32[4,17,8], index: 0, kind: input, shape index: {}]   ;;  %s306_s1 = inlined_call_operand.vmem [shape: f32[17,8], index: 1, kind: input, shape index: {}]   ;;  %s307_s2 = inlined_call_operand.vmem [shape: f32[1,8], index: 2, kind: input, shape index: {}]   ;;  %s308_s3 = inlined_call_operand.vmem [shape: f32[17,1], index: 3, kind: input, shape index: {}]   ;;  %s309_s4 = inlined_call_operand.hbm [shape: f32[1,1,128], index: 4, kind: output, shape index: {}]  }
   0x1   :  { %v73_v0 = vld [vmem:[%s308_s3] sm:$0xff]  ;;  %v75_v1 = vld [vmem:[%s308_s3 + $0x10] sm:$0x1]  ;;  %171 = vset.pattern.permute.xlu0 %v203_v2  ;;  %172 = vset.pattern.permute.xlu1 %v203_v2  ;;  %v74_v3 = vld [vmem:[%s308_s3 + $0x8] sm:$0xff] }
   0x2   :  { %78 = vperm.xlu0 %171, %v73_v0   ;;  %88 = vperm.xlu1 %172, %v75_v1  }
   0x6   :  { %83 = vperm.xlu0 %171, %v74_v3  }
   0x7   :  { %9 = vsyncpa [#allocation3], 0  ;;  %v243_v4 = vld [vmem:[%s306_s1] sm:$0xff]  ;;  %v248_v5 = vld [vmem:[%s306_s1 + $0x8] sm:$0xff]  ;;  %v204_v7 = vmov 0.0   ;;  %vm61_vm3 = vcmask 1040384   ;;  %v123_v1 = vlaneseq }
   0x8   :  { %v253_v6 = vld [vmem:[%s306_s1 + $0x10] sm:$0x1]  ;;  %vm51_vm0 = vcmp.ne.f32.partialorder %v243_v4, 0.0  ;;  %vm52_vm1 = vcmp.ne.f32.partialorder %v248_v5, 0.0  ;;  %v18_v15 = vld [vmem:[%s305_s0] sm:$0xff]  ;;  %v155_v16 = vld [vmem:[%s305_s0 + $0x18] sm:$0xff] }
   0x9   :  { %vm53_vm2 = vcmp.ne.f32.partialorder %v253_v6, 0.0  ;;  %v164_v8 = vsel %vm51_vm0, 1.0, %v204_v7  ;;  %v165_v9 = vsel %vm52_vm1, 1.0, %v204_v7  ;;  %v158_v18 = vld [vmem:[%s305_s0 + $0x30] sm:$0xff]  ;;  %v161_v19 = vld [vmem:[%s305_s0 + $0x48] sm:$0xff]  ;;  %v159_v28 = vld [vmem:[%s305_s0 + $0x38] sm:$0xff] }
   0xa   :  { %v166_v10 = vsel %vm53_vm2, 1.0, %v204_v7  ;;  %v60_v11 = vadd.f32 %v165_v9, %v164_v8  ;;  %v20_v20 = vld [vmem:[%s305_s0 + $0x10] sm:$0x1]  ;;  %v157_v21 = vld [vmem:[%s305_s0 + $0x28] sm:$0x1]  ;;  %v33_v24 = vsub.f32 %v18_v15, %v158_v18  ;;  %v36_v26 = vsub.f32 %v155_v16, %v161_v19  ;;  %v156_v31 = vld [vmem:[%s305_s0 + $0x20] sm:$0xff] }
   0xb   :  { %v62_v12 = vsel %vm61_vm3, %v166_v10, 0.0  ;;  %v160_v22 = vld [vmem:[%s305_s0 + $0x40] sm:$0x1]  ;;  %v163_v23 = vld [vmem:[%s305_s0 + $0x58] sm:$0x1]  ;;  %v19_v27 = vld [vmem:[%s305_s0 + $0x8] sm:$0xff] }
   0xc   :  { %v63_v13 = vadd.f32 %v62_v12, %v60_v11  ;;  %v35_v29 = vsub.f32 %v20_v20, %v160_v22  ;;  %v38_v30 = vsub.f32 %v157_v21, %v163_v23  ;;  %v162_v32 = vld [vmem:[%s305_s0 + $0x50] sm:$0xff]  ;;  %v39_v33 = vmul.f32 %v33_v24, %v33_v24  ;;  %v167_v45 = vld [vmem:[%s307_s2] ss:$0 sm:$0xff]  ;;  %s205_s0 = smov [#allocation2]  }
   0xd   :  { %v34_v34 = vsub.f32 %v19_v27, %v159_v28  ;;  %v42_v36 = vmul.f32 %v36_v26, %v36_v26  ;;  %v37_v37 = vsub.f32 %v156_v31, %v162_v32  ;;  %v124_v11 = vand.u32 127, %v123_v1  ;;  %s147_s2 = sshll.u32 %s205_s0, 4  ;;  %s148_s2 = int_to_ptr.vmem [resolvable:$true] %s147_s2 }
   0xe   :  { %v64_v14 = vrot.slane %v63_v13, 4  ;;  %v41_v38 = vmul.f32 %v35_v29, %v35_v29  ;;  %v44_v39 = vmul.f32 %v38_v30, %v38_v30  ;;  %s181_s25 = scalar_lea.vmem %s148_s2, 16  ;;  %s185_s26 = scalar_lea.vmem %s148_s2, 32 }
   0xf   :  { %v45_v41 = vadd.f32 %v42_v36, %v39_v33  ;;  %v40_v42 = vmul.f32 %v34_v34, %v34_v34  ;;  %v43_v43 = vmul.f32 %v37_v37, %v37_v37  ;;  %vm127_vm4 = vcmp.lt.s32.totalorder %v124_v11, 8  ;;  %p182_p0 = scmp.ne.s32.totalorder %s148_s2, %s181_s25  ;;  %p186_p1 = scmp.lt.s32.totalorder %s148_s2, %s148_s2 }
  0x10   :  { %v65_v17 = vadd.f32 %v64_v14, %v63_v13  ;;  %v47_v44 = vadd.f32 %v44_v39, %v41_v38  ;;  %p187_p2 = scmp.lt.s32.totalorder %s185_s26, %s181_s25 }
  0x11   :  { %v46_v50 = vadd.f32 %v43_v43, %v40_v42 }
  0x12   :  { %v66_v25 = vrot.slane %v65_v17, 2  ;;  %p188_p3 = por %p187_p2, %p186_p1 }
  0x14   :  { %v67_v35 = vadd.f32 %v66_v25, %v65_v17  ;;  %p189_p4 = pnand %p188_p3, %p182_p0 }
  0x16   :  { %v68_v40 = vrot.slane %v67_v35, 1 }
  0x18   :  { %v69_v48 = vadd.f32 %v68_v40, %v67_v35 }
  0x1a   :  { %v70_v55 = vadd.f32 1e-09, %v69_v48 }
  0x1c   :  { %173 = vrcp.f32 %v70_v55 }
  0x29   :  { %v174_v0 = vpop.eup %173 }
  0x2a   :  { %v72_v10 = vmul.f32 17.0, %v174_v0 }
  0x7d   :  { %v79_v46 = vpop.permute.xlu0 %78  ;;  %v89_v47 = vpop.permute.xlu1 %88 }
  0x7e   :  { %v91_v49 = vmul.f32 %v79_v46, %v45_v41  ;;  %v93_v51 = vmul.f32 %v89_v47, %v47_v44 }
  0x80   :  { %v101_v52 = vmul.f32 %v167_v45, %v91_v49  ;;  %v103_v53 = vmul.f32 %v167_v45, %v93_v51 }
  0x81   :  { %v84_v54 = vpop.permute.xlu0 %83 }
  0x82   :  { %v104_v56 = vsub.f32 0.0, %v101_v52  ;;  %v92_v57 = vmul.f32 %v84_v54, %v46_v50  ;;  %v106_v58 = vsub.f32 0.0, %v103_v53 }
  0x84   :  { %v107_v59 = vmul.f32 1.442695, %v104_v56  ;;  %v102_v60 = vmul.f32 %v167_v45, %v92_v57  ;;  %v111_v61 = vmul.f32 1.442695, %v106_v58 }
  0x86   :  { %175 = vpow2.f32 %v107_v59  ;;  %v105_v62 = vsub.f32 0.0, %v102_v60 }
  0x87   :  { %177 = vpow2.f32 %v111_v61 }
  0x88   :  { %v109_v63 = vmul.f32 1.442695, %v105_v62 }
  0x8a   :  { %179 = vpow2.f32 %v109_v63 }
  0x93   :  { %v176_v2 = vpop.eup %175 }
  0x94   :  { %v178_v3 = vpop.eup %177  ;;  %v113_v7 = vsub.f32 1.0, %v176_v2 }
  0x95   :  { %v115_v8 = vsub.f32 1.0, %v178_v3 }
  0x96   :  { %v116_v9 = vmul.f32 %v113_v7, %v243_v4 }
  0x97   :  { %v180_v12 = vpop.eup %179  ;;  %v118_v13 = vmul.f32 %v115_v8, %v253_v6 }
  0x98   :  { %v114_v14 = vsub.f32 1.0, %v180_v12  ;;  %v119_v17 = vmul.f32 %v116_v9, %v72_v10 }
  0x99   :  { %v121_v15 = vmul.f32 %v118_v13, %v72_v10 }
  0x9a   :  { %v117_v16 = vmul.f32 %v114_v14, %v248_v5  ;;  %v128_v20 = vsel %vm127_vm4, %v119_v17, 0.0 }
  0x9b   :  { %v130_v18 = vsel %vm127_vm4, %v121_v15, 0.0 }
  0x9c   :  { %v120_v19 = vmul.f32 %v117_v16, %v72_v10  ;;  %v132_v22 = vsel %vm61_vm3, %v130_v18, 0.0 }
  0x9e   :  { %v129_v21 = vsel %vm127_vm4, %v120_v19, 0.0 }
  0x9f   :  { %v131_v23 = vadd.f32 %v129_v21, %v128_v20 }
  0xa1   :  { %v133_v24 = vadd.f32 %v132_v22, %v131_v23 }
  0xa3   :  { %v134_v4 = vrot.slane %v133_v24, 4 }
  0xa5   :  { %v135_v25 = vadd.f32 %v134_v4, %v133_v24 }
  0xa7   :  { %v136_v26 = vrot.slane %v135_v25, 2 }
  0xa9   :  { %v137_v27 = vadd.f32 %v136_v26, %v135_v25 }
  0xab   :  { %v138_v6 = vrot.slane %v137_v27, 1 }
  0xad   :  { %v139_v28 = vadd.f32 %v138_v6, %v137_v27 }
  0xaf   :  { %140 = vst [vmem:[#allocation2] sm:$0x1] %v139_v28 }
  0xb0   :  { %192 = shalt.err (!%p189_p4)
}
  0xb1   :  { %150 = dma.vmem_to_hbm [thread:$0]  %s148_s2, 16, %s309_s4, [#allocation3]  }
  0xb2   :  { %201 = dma.done.wait [#allocation3], 16  }
  0xb3   :  { %202 = vsyncadd [#allocation3], 4294967280 }
  0xb4   :  { %154 = vsyncpa [#allocation3], 1 }

</bundles_post_ra>
